<compile_context>
chip_gen: v6e
topology: v6e:2x2x1
jax: 0.10.0
libtpu: 0.0.40
codegen_flags: <defaults>
</compile_context>

<pallas_src>
import functools

import jax
import jax.numpy as jnp
import numpy as np
from jax.experimental import pallas as pl
from jax.experimental.pallas import tpu as pltpu


def _pow(base, exponent):
    """x ** r for positive base (exp/log on the EUP)."""
    return jnp.exp(exponent * jnp.log(base))


# ----------------------------------------------------------------------------
# Kernel
# ----------------------------------------------------------------------------
def _gm_pool_kernel(x_ref, r_ref, o_ref, m_sc, s_sc, *, inv_n):
    # x_ref: (tile_n, tile_c) slab of the repacked input
    # r_ref: (1, tile_c) per-channel exponents
    # o_ref: (1, tile_c) output row (written on the last N step only)
    # m_sc / s_sc: (1, tile_c) f32 running max / running sum of norm**r
    k = pl.program_id(1)                              # reduction (N) step

    x = x_ref[...].astype(jnp.float32)                # (tile_n, tile_c)
    r = r_ref[...].astype(jnp.float32)                # (1, tile_c)

    tile_max = jnp.max(x, axis=0, keepdims=True)      # (1, tile_c), XLU reduce

    @pl.when(k == 0)
    def _():
        m_sc[...] = tile_max
        s_sc[...] = jnp.zeros_like(s_sc)

    m_old = m_sc[...]
    m_new = jnp.maximum(m_old, tile_max)              # global running max
    # One exact reciprocal per channel; per-element normalization is then a
    # VALU multiply instead of a divide.
    inv_m = pl.reciprocal(m_new, approx=False)

    # Online rescale: previously accumulated (x/m_old)**r becomes (x/m_new)**r
    # after multiplying by (m_old/m_new)**r.  Equals 1 when the max unchanged.
    rescale = _pow(m_old * inv_m, r)                  # (1, tile_c)
    p = _pow(x * inv_m, r)                            # (tile_n, tile_c), EUP log+exp
    s_sc[...] = s_sc[...] * rescale + jnp.sum(p, axis=0, keepdims=True)
    m_sc[...] = m_new

    @pl.when(k == pl.num_programs(1) - 1)
    def _():
        mean_p = s_sc[...] * inv_n                    # mean over the full N
        gm = _pow(mean_p, pl.reciprocal(r, approx=False))
        o_ref[...] = (gm * m_sc[...]).astype(o_ref.dtype)


# ----------------------------------------------------------------------------
# Tile-size helpers (sized so double-buffered tiles fit v7x's smaller VMEM)
# ----------------------------------------------------------------------------
def _pick_tile_c(c_pad, max_tile_c):
    """Largest multiple of 128 that divides c_pad and is <= max_tile_c."""
    best = 128
    t = 128
    while t <= min(c_pad, max_tile_c):
        if c_pad % t == 0:
            best = t
        t += 128
    return best


def _pick_tile_n(n, max_tile_n):
    """Largest divisor of n that is <= max_tile_n and a multiple of 8."""
    if n <= max_tile_n:
        return n
    for t in range(max_tile_n, 0, -1):
        if n % t == 0 and t % 8 == 0:
            return t
    return n  # fall back: whole reduction axis in one block (always legal)


# ----------------------------------------------------------------------------
# Wrapper
# ----------------------------------------------------------------------------
def pool_multi_range_gm(x, r, *, max_tile_n=512, max_tile_c=512):
    """x: (B, N, F), r: (1, F) -> (B, F).  Matches PoolMultiRangeGM.forward."""
    B, N, F = x.shape
    assert r.shape == (1, F)
    out_dtype = x.dtype

    # --- lane-dense repack: fold batch into the channel (lane) axis ---------
    C = B * F
    x2 = jnp.transpose(x, (1, 0, 2)).reshape(N, C)    # x2[n, b*F+f] = x[b, n, f]
    r2 = jnp.tile(r, (1, B))                          # r2[0, b*F+f] = r[0, f]

    LANE = 128
    C_pad = pl.cdiv(C, LANE) * LANE
    if C_pad != C:
        # Pad lanes with 1.0 in both x and r: alpha=1, norm=1, 1**1=1 -> finite.
        x2 = jnp.pad(x2, ((0, 0), (0, C_pad - C)), constant_values=1.0)
        r2 = jnp.pad(r2, ((0, 0), (0, C_pad - C)), constant_values=1.0)

    tile_c = _pick_tile_c(C_pad, max_tile_c)
    tile_n = _pick_tile_n(N, max_tile_n)
    grid = (C_pad // tile_c, N // tile_n)             # channels parallel, N last

    kernel = functools.partial(_gm_pool_kernel, inv_n=1.0 / float(N))

    out2 = pl.pallas_call(
        kernel,
        out_shape=jax.ShapeDtypeStruct((1, C_pad), jnp.float32),
        grid=grid,
        in_specs=[
            pl.BlockSpec((tile_n, tile_c), lambda c, n: (n, c)),
            pl.BlockSpec((1, tile_c), lambda c, n: (0, c)),
        ],
        out_specs=pl.BlockSpec((1, tile_c), lambda c, n: (0, c)),
        scratch_shapes=[
            pltpu.VMEM((1, tile_c), jnp.float32),     # running max (alpha)
            pltpu.VMEM((1, tile_c), jnp.float32),     # running sum of norm**r
        ],
        compiler_params=pltpu.CompilerParams(
            dimension_semantics=("parallel", "arbitrary")),
        cost_estimate=pl.CostEstimate(
            flops=6 * N * C_pad,
            transcendentals=2 * N * C_pad,            # log+exp per power elem
            bytes_accessed=4 * (N * C_pad + 3 * C_pad)),
    )(x2, r2)

    return out2[:, :C].reshape(B, F).astype(out_dtype)


# ----------------------------------------------------------------------------
# Buffer init / reference
# ----------------------------------------------------------------------------
def make_r(r_min, r_max, fs_num):
    """Same formula as the PyTorch __init__ (buffer stored as (1, fs_num))."""
    d = float(r_max - r_min) / float(fs_num)
    r = jnp.array([r_min + float(i) * d for i in range(fs_num)], dtype=jnp.float32)
    return r.reshape(1, fs_num)


def reference_forward(x, r):
    """Pure-JAX mirror of the torch forward."""
    alpha = jnp.max(x, axis=1, keepdims=True)         # (B, 1, F)
    norm = x / alpha
    nr = jnp.mean(norm ** r[None, :, :], axis=1) ** (1.0 / r)
    return nr * alpha[:, 0, :]


if __name__ == "__main__":
    r_min, r_max = 1.0, 5.0
    key = jax.random.PRNGKey(0)
    k1, k2 = jax.random.split(key)

    # Test 1: small shapes implied by the module's forward (batch, pooled, fs_num).
    B, N, fs_num = 2, 8, 32
    x = jax.random.uniform(k1, (B, N, fs_num), jnp.float32, 0.1, 2.0)
    r = make_r(r_min, r_max, fs_num)
    out = jax.block_until_ready(pool_multi_range_gm(x, r))
    np.testing.assert_allclose(np.asarray(out), np.asarray(reference_forward(x, r)),
                               rtol=2e-4, atol=2e-4)

    # Test 2: force multiple reduction (N) and channel tiles to exercise the
    # online-rescale accumulator and the pipelined grid.
    B2, N2, F2 = 4, 64, 96
    x_big = jax.random.uniform(k2, (B2, N2, F2), jnp.float32, 0.05, 3.0)
    r_big = make_r(0.5, 4.0, F2)
    out_big = jax.block_until_ready(
        pool_multi_range_gm(x_big, r_big, max_tile_n=16, max_tile_c=128))
    np.testing.assert_allclose(np.asarray(out_big),
                               np.asarray(reference_forward(x_big, r_big)),
                               rtol=2e-4, atol=2e-4)

    print("KERNEL_OK")
</pallas_src>

<mosaic_0001>
module attributes {stable_mosaic.version = 11 : i64} {
  func.func @_gm_pool_kernel(%arg0: i32, %arg1: i32, %arg2: memref<8x128xf32, #tpu.memory_space<vmem>>, %arg3: memref<1x128xf32, #tpu.memory_space<vmem>>, %arg4: memref<1x128xf32, #tpu.memory_space<vmem>>, %arg5: memref<1x128xf32, #tpu.memory_space<vmem>>, %arg6: memref<1x128xf32, #tpu.memory_space<vmem>>) attributes {dimension_semantics = [#tpu.dimension_semantics<parallel>, #tpu.dimension_semantics<arbitrary>], iteration_bounds = array<i64: 1, 1>, scalar_prefetch = 0 : i64, scratch_operands = 2 : i64, tpu.core_type = #tpu.core_type<tc>, window_params = [{transform_indices = @transform_0, window_bounds = array<i64: 8, 128>}, {transform_indices = @transform_1, window_bounds = array<i64: 1, 128>}, {transform_indices = @transform_2, window_bounds = array<i64: 1, 128>}]} {
    %c0 = arith.constant 0 : index
    %c0_0 = arith.constant 0 : index
    %0 = vector.load %arg2[%c0, %c0_0] : memref<8x128xf32, #tpu.memory_space<vmem>>, vector<8x128xf32>
    %c0_1 = arith.constant 0 : index
    %c0_2 = arith.constant 0 : index
    %1 = vector.load %arg3[%c0_1, %c0_2] : memref<1x128xf32, #tpu.memory_space<vmem>>, vector<1x128xf32>
    %cst = arith.constant dense<0xFF800000> : vector<128xf32>
    %2 = vector.multi_reduction <maximumf>, %0, %cst [0] : vector<8x128xf32> to vector<128xf32>
    %3 = vector.shape_cast %2 : vector<128xf32> to vector<1x128xf32>
    %c0_i32 = arith.constant 0 : i32
    %4 = arith.cmpi eq, %arg1, %c0_i32 : i32
    %5 = arith.extui %4 : i1 to i32
    %c0_i32_3 = arith.constant 0 : i32
    %6 = arith.cmpi ne, %5, %c0_i32_3 : i32
    scf.if %6 {
      %c0_15 = arith.constant 0 : index
      %c0_16 = arith.constant 0 : index
      %30 = vector.load %arg5[%c0_15, %c0_16] : memref<1x128xf32, #tpu.memory_space<vmem>>, vector<1x128xf32>
      tpu.vector_store %arg5[%c0_15, %c0_16], %3 {strides = array<i32>} : memref<1x128xf32, #tpu.memory_space<vmem>>, vector<1x128xf32>,
      %cst_17 = arith.constant 0.000000e+00 : f32
      %31 = vector.broadcast %cst_17 : f32 to vector<1x128xf32>
      %c0_18 = arith.constant 0 : index
      %c0_19 = arith.constant 0 : index
      %32 = vector.load %arg6[%c0_18, %c0_19] : memref<1x128xf32, #tpu.memory_space<vmem>>, vector<1x128xf32>
      tpu.vector_store %arg6[%c0_18, %c0_19], %31 {strides = array<i32>} : memref<1x128xf32, #tpu.memory_space<vmem>>, vector<1x128xf32>,
    } else {
    }
    %c0_4 = arith.constant 0 : index
    %c0_5 = arith.constant 0 : index
    %7 = vector.load %arg5[%c0_4, %c0_5] : memref<1x128xf32, #tpu.memory_space<vmem>>, vector<1x128xf32>
    %8 = arith.maximumf %7, %3 : vector<1x128xf32>
    %9 = tpu.reciprocal %8 : vector<1x128xf32> -> vector<1x128xf32>
    %10 = arith.mulf %7, %9 : vector<1x128xf32>
    %11 = math.log %10 : vector<1x128xf32>
    %12 = arith.mulf %1, %11 : vector<1x128xf32>
    %13 = math.exp %12 : vector<1x128xf32>
    %14 = vector.broadcast %9 : vector<1x128xf32> to vector<8x128xf32>
    %15 = arith.mulf %0, %14 : vector<8x128xf32>
    %16 = math.log %15 : vector<8x128xf32>
    %17 = vector.broadcast %1 : vector<1x128xf32> to vector<8x128xf32>
    %18 = arith.mulf %17, %16 : vector<8x128xf32>
    %19 = math.exp %18 : vector<8x128xf32>
    %c0_6 = arith.constant 0 : index
    %c0_7 = arith.constant 0 : index
    %20 = vector.load %arg6[%c0_6, %c0_7] : memref<1x128xf32, #tpu.memory_space<vmem>>, vector<1x128xf32>
    %21 = arith.mulf %20, %13 : vector<1x128xf32>
    %cst_8 = arith.constant dense<0.000000e+00> : vector<128xf32>
    %22 = vector.multi_reduction <add>, %19, %cst_8 [0] : vector<8x128xf32> to vector<128xf32>
    %23 = vector.shape_cast %22 : vector<128xf32> to vector<1x128xf32>
    %24 = arith.addf %21, %23 : vector<1x128xf32>
    %c0_9 = arith.constant 0 : index
    %c0_10 = arith.constant 0 : index
    %25 = vector.load %arg6[%c0_9, %c0_10] : memref<1x128xf32, #tpu.memory_space<vmem>>, vector<1x128xf32>
    tpu.vector_store %arg6[%c0_9, %c0_10], %24 {strides = array<i32>} : memref<1x128xf32, #tpu.memory_space<vmem>>, vector<1x128xf32>,
    %c0_11 = arith.constant 0 : index
    %c0_12 = arith.constant 0 : index
    %26 = vector.load %arg5[%c0_11, %c0_12] : memref<1x128xf32, #tpu.memory_space<vmem>>, vector<1x128xf32>
    tpu.vector_store %arg5[%c0_11, %c0_12], %8 {strides = array<i32>} : memref<1x128xf32, #tpu.memory_space<vmem>>, vector<1x128xf32>,
    %c0_i32_13 = arith.constant 0 : i32
    %27 = arith.cmpi eq, %arg1, %c0_i32_13 : i32
    %28 = arith.extui %27 : i1 to i32
    %c0_i32_14 = arith.constant 0 : i32
    %29 = arith.cmpi ne, %28, %c0_i32_14 : i32
    scf.if %29 {
      %c0_15 = arith.constant 0 : index
      %c0_16 = arith.constant 0 : index
      %30 = vector.load %arg6[%c0_15, %c0_16] : memref<1x128xf32, #tpu.memory_space<vmem>>, vector<1x128xf32>
      %cst_17 = arith.constant 1.250000e-01 : f32
      %31 = vector.broadcast %cst_17 : f32 to vector<1x128xf32>
      %32 = arith.mulf %30, %31 : vector<1x128xf32>
      %33 = tpu.reciprocal %1 : vector<1x128xf32> -> vector<1x128xf32>
      %34 = math.log %32 : vector<1x128xf32>
      %35 = arith.mulf %33, %34 : vector<1x128xf32>
      %36 = math.exp %35 : vector<1x128xf32>
      %c0_18 = arith.constant 0 : index
      %c0_19 = arith.constant 0 : index
      %37 = vector.load %arg5[%c0_18, %c0_19] : memref<1x128xf32, #tpu.memory_space<vmem>>, vector<1x128xf32>
      %38 = arith.mulf %36, %37 : vector<1x128xf32>
      %c0_20 = arith.constant 0 : index
      %c0_21 = arith.constant 0 : index
      %39 = vector.load %arg4[%c0_20, %c0_21] : memref<1x128xf32, #tpu.memory_space<vmem>>, vector<1x128xf32>
      tpu.vector_store %arg4[%c0_20, %c0_21], %38 {strides = array<i32>} : memref<1x128xf32, #tpu.memory_space<vmem>>, vector<1x128xf32>,
    } else {
    }
    return
  }
  func.func @transform_0(%arg0: i32, %arg1: i32) -> (i32, i32) {
    %c0_i32 = arith.constant 0 : i32
    return %arg1, %arg0 : i32, i32
  }
  func.func @transform_1(%arg0: i32, %arg1: i32) -> (i32, i32) {
    %c0_i32 = arith.constant 0 : i32
    %c0_i32_0 = arith.constant 0 : i32
    return %c0_i32, %arg0 : i32, i32
  }
  func.func @transform_2(%arg0: i32, %arg1: i32) -> (i32, i32) {
    %c0_i32 = arith.constant 0 : i32
    %c0_i32_0 = arith.constant 0 : i32
    return %c0_i32, %arg0 : i32, i32
  }
}

</mosaic_0001>

<bundles_post_ra>
// kernel: tpu_custom_call.1
= control target key start
LH: loop header
LB: loop body
LE: loop exit
PB: predicated region body
PF: predicated region fallthrough
CT: control target
= control target key end

     0   :  { %7 = vsyncpa [#allocation5], 0  ;;  %s195_s0 = inlined_call_operand.hbm [shape: f32[8,128], index: 0, kind: input, shape index: {}]   ;;  %s196_s1 = inlined_call_operand.vmem [shape: f32[1,128], index: 1, kind: input, shape index: {}]   ;;  %s197_s2 = inlined_call_operand.hbm [shape: f32[1,128], index: 2, kind: output, shape index: {}]  }
   0x1   :  { %8 = vsyncpa [#allocation6], 0  ;;  %s168_s9 = smov [#allocation4]  }
   0x2   :  { %s15_s10 = sshll.u32 %s168_s9, 4  ;;  %s16_s10 = int_to_ptr.vmem [resolvable:$true] %s15_s10 }
   0x3   :  { %s132_s11 = scalar_lea.vmem %s16_s10, 128  ;;  %p137_p1 = scmp.lt.s32.totalorder %s16_s10, %s16_s10 }
   0x4   :  { %p133_p0 = scmp.ne.s32.totalorder %s16_s10, %s132_s11  ;;  %p138_p2 = scmp.lt.s32.totalorder %s132_s11, %s132_s11 }
   0x6   :  { %p139_p3 = por %p138_p2, %p137_p1 }
   0x8   :  { %p140_p4 = pnand %p139_p3, %p133_p0 }
   0xa   :  { %143 = shalt.err (!%p140_p4)
}
   0xb   :  { %18 = dma.hbm_to_vmem [thread:$0]  %s195_s0, 128, %s16_s10, [#allocation5]  }
   0xc   :  { %164 = dma.done.wait [#allocation5], 128  }
   0xd   :  { %165 = vsyncadd [#allocation5], 4294967168  ;;  %v169_v0 = vmov 0.0   ;;  %v24_v1 = vld [vmem:[#allocation4] sm:$0xff]  ;;  %v48_v10 = vlaneseq  ;;  %v25_v17 = vld [vmem:[%s196_s1] sm:$0x1] }
   0xe   :  { %37 = vst [vmem:[#allocation3] sm:$0x1] %v169_v0  ;;  %v26_v2 = vrot.slane %v24_v1, 4  ;;  %s170_s1 = smov [#allocation7]  }
   0xf   :  { %v49_v11 = vshrl.u32 %v48_v10, 7  ;;  %s96_s15 = sshll.u32 %s170_s1, 4  ;;  %s97_s15 = int_to_ptr.vmem [resolvable:$true] %s96_s15 }
  0x10   :  { %v27_v3 = vmax.f32 %v24_v1, %v26_v2  ;;  %s144_s16 = scalar_lea.vmem %s97_s15, 16  ;;  %s148_s17 = scalar_lea.vmem %s97_s15, 32 }
  0x11   :  { %v50_v12 = vsub.s32 0, %v49_v11  ;;  %p145_p5 = scmp.ne.s32.totalorder %s97_s15, %s144_s16  ;;  %p149_p6 = scmp.lt.s32.totalorder %s97_s15, %s97_s15 }
  0x12   :  { %v28_v4 = vrot.slane %v27_v3, 2  ;;  %p150_p7 = scmp.lt.s32.totalorder %s148_s17, %s144_s16 }
  0x13   :  { %v60_v19 = vrot.slane %v25_v17, %v50_v12 }
  0x14   :  { %v29_v5 = vmax.f32 %v27_v3, %v28_v4  ;;  %p151_p8 = por %p150_p7, %p149_p6 }
  0x15   :  { %v65_v33 = vld [vmem:[#allocation3] sm:$0x1] }
  0x16   :  { %v30_v6 = vrot.slane %v29_v5, 1  ;;  %p152_p9 = pnand %p151_p8, %p145_p5 }
  0x18   :  { %v31_v7 = vmax.f32 %v29_v5, %v30_v6 }
  0x1a   :  { %36 = vst [vmem:[#allocation2] sm:$0x1] %v31_v7 }
  0x21   :  { %v38_v8 = vld [vmem:[#allocation2] sm:$0x1] }
  0x22   :  { %v39_v9 = vmax.f32 %v38_v8, %v31_v7 }
  0x24   :  { %108 = vrcp.f32 %v39_v9  ;;  %75 = vst [vmem:[#allocation2] sm:$0x1] %v39_v9 }
  0x2b   :  { %v87_v46 = vld [vmem:[#allocation2] sm:$0x1] }
  0x31   :  { %v109_v13 = vpop.eup %108 }
  0x32   :  { %v41_v14 = vmul.f32 %v109_v13, %v38_v8  ;;  %v51_v15 = vrot.slane %v109_v13, %v50_v12 }
  0x34   :  { %v53_v16 = vmul.f32 %v51_v15, %v24_v1  ;;  %110 = vlog2.f32 %v41_v14 }
  0x36   :  { %112 = vlog2.f32 %v53_v16 }
  0x41   :  { %v111_v18 = vpop.eup %110 }
  0x42   :  { %v43_v22 = vmul.f32 0.6931472, %v111_v18 }
  0x43   :  { %v113_v20 = vpop.eup %112 }
  0x44   :  { %v55_v21 = vmul.f32 0.6931472, %v113_v20  ;;  %v44_v25 = vmul.f32 %v43_v22, %v25_v17 }
  0x46   :  { %v62_v23 = vmul.f32 %v60_v19, %v55_v21  ;;  %v45_v26 = vmul.f32 1.442695, %v44_v25 }
  0x48   :  { %v63_v24 = vmul.f32 1.442695, %v62_v23 }
  0x4a   :  { %114 = vpow2.f32 %v63_v24 }
  0x4b   :  { %116 = vpow2.f32 %v45_v26 }
  0x4c   :  { %118 = vrcp.f32 %v25_v17 }
  0x57   :  { %v115_v27 = vpop.eup %114 }
  0x58   :  { %v67_v28 = vrot.slane %v115_v27, 4  ;;  %v117_v32 = vpop.eup %116 }
  0x59   :  { %v66_v35 = vmul.f32 %v117_v32, %v65_v33  ;;  %v119_v40 = vpop.eup %118 }
  0x5a   :  { %v68_v29 = vadd.f32 %v115_v27, %v67_v28 }
  0x5c   :  { %v69_v30 = vrot.slane %v68_v29, 2 }
  0x5e   :  { %v70_v31 = vadd.f32 %v69_v30, %v68_v29 }
  0x60   :  { %v71_v34 = vrot.slane %v70_v31, 1 }
  0x62   :  { %v72_v36 = vadd.f32 %v71_v34, %v70_v31 }
  0x64   :  { %v73_v37 = vadd.f32 %v72_v36, %v66_v35 }
  0x66   :  { %74 = vst [vmem:[#allocation3] sm:$0x1] %v73_v37 }
  0x6d   :  { %v79_v38 = vld [vmem:[#allocation3] sm:$0x1] }
  0x6e   :  { %v80_v39 = vmul.f32 0.125, %v79_v38 }
  0x70   :  { %120 = vlog2.f32 %v80_v39 }
  0x7d   :  { %v121_v41 = vpop.eup %120 }
  0x7e   :  { %v83_v42 = vmul.f32 0.6931472, %v121_v41 }
  0x80   :  { %v84_v43 = vmul.f32 %v119_v40, %v83_v42 }
  0x82   :  { %v85_v44 = vmul.f32 1.442695, %v84_v43 }
  0x84   :  { %122 = vpow2.f32 %v85_v44 }
  0x91   :  { %v123_v45 = vpop.eup %122 }
  0x92   :  { %v88_v47 = vmul.f32 %v123_v45, %v87_v46 }
  0x94   :  { %89 = vst [vmem:[#allocation7] sm:$0x1] %v88_v47 }
  0x95   :  { %155 = shalt.err (!%p152_p9)
}
  0x96   :  { %99 = dma.vmem_to_hbm [thread:$0]  %s97_s15, 16, %s197_s2, [#allocation6]  }
  0x97   :  { %166 = dma.done.wait [#allocation6], 16  }
  0x98   :  { %167 = vsyncadd [#allocation6], 4294967280 }
  0x99   :  { %103 = vsyncpa [#allocation5], 1 }
  0x9a   :  { %104 = vsyncpa [#allocation6], 1 }

</bundles_post_ra>
